<compile_context>
chip_gen: v6e
topology: v6e:2x2x1
jax: 0.10.0
libtpu: 0.0.40
codegen_flags: <defaults>
</compile_context>

<pallas_src>
import functools

import jax
import jax.numpy as jnp
from jax.experimental import pallas as pl
from jax.experimental.pallas import tpu as pltpu


def _round_up(x, m):
    return ((x + m - 1) // m) * m


def _spatial_attention_kernel(f_ref, m_ref, w1t_ref, b1_ref, w2t_ref, b2_ref,
                              o_ref, *, num_ch, hw_pad, inv_hw):
    # f_ref   : (TB, C*HWp)  features for TB batch elements (lane-dense)
    # m_ref   : (TB, HWp)    interpolated spatial mask
    # w1t/w2t : (C, C)       1x1 conv weights (pre-transposed)
    # b1/b2   : (1, C)       biases
    f = f_ref[...]
    m = m_ref[...]

    # Masked adaptive average pool: one static, 128-aligned lane slice per
    # channel (C is small), lane reduction over the spatial extent.
    cols = []
    for c in range(num_ch):
        fc = f[:, c * hw_pad:(c + 1) * hw_pad]                  # (TB, HWp)
        cols.append(jnp.sum(fc * m, axis=1, keepdims=True))     # (TB, 1)
    avg = jnp.concatenate(cols, axis=1) * inv_hw                # (TB, C)

    # Gate: conv1x1 -> relu -> conv1x1 -> sigmoid, batched across the block.
    # (For tiny C this pads the MXU, but it is a single push per step.)
    h = jnp.dot(avg, w1t_ref[...], preferred_element_type=jnp.float32)
    h = jnp.maximum(h + b1_ref[...], 0.0)                       # (TB, C)
    g = jnp.dot(h, w2t_ref[...], preferred_element_type=jnp.float32)
    g = jax.nn.sigmoid(g + b2_ref[...])                         # (TB, C)

    # out = g * original (unmasked) features; lane-dense stores per channel.
    for c in range(num_ch):
        sl = slice(c * hw_pad, (c + 1) * hw_pad)
        o_ref[:, sl] = (g[:, c:c + 1] * f[:, sl]).astype(o_ref.dtype)


def _nearest_interp(mask, H, W):
    # F.interpolate(mask.unsqueeze(1), size=(H, W), mode='nearest')
    # nearest index: floor(out_idx * in_size / out_size)
    N, h0, w0 = mask.shape
    rows = (jnp.arange(H) * h0) // H
    cols = (jnp.arange(W) * w0) // W
    return mask[:, rows[:, None], cols[None, :]]     # (N, H, W)


def _pick_block_batch(n, bytes_per_batch):
    """Batch elements per grid step.

    - small batches (<= 8): one block covering the full batch,
    - otherwise a multiple of 8 (full 8-sublane packing) sized so each step
      moves ~2 MiB of feature data, capped so the grid keeps >= 2 steps
      (v7x has 2 TensorCores sharded over the 'parallel' grid axis).
    """
    if n <= 8:
        return n
    target = 2 * 1024 * 1024
    tb = _round_up(max(1, target // max(1, bytes_per_batch)), 8)
    tb = min(tb, max(8, (n // 2) // 8 * 8))
    return tb


def spatial_attention(Fs, Ys, w1, b1, w2, b2):
    """Fs: (N, C, H, W) float32;  Ys: (N, h0, w0) float32 mask."""
    N, C, H, W = Fs.shape
    HW = H * W
    HWp = _round_up(HW, 128)          # lane-dense spatial extent

    m = _nearest_interp(Ys, H, W).astype(Fs.dtype).reshape(N, HW)
    f = Fs.reshape(N, C, HW)
    if HWp != HW:                      # pad spatial so lane slices stay aligned
        f = jnp.pad(f, ((0, 0), (0, 0), (0, HWp - HW)))
        m = jnp.pad(m, ((0, 0), (0, HWp - HW)))
    f2 = f.reshape(N, C * HWp)         # batch on sublanes, chan*spatial on lanes

    itemsize = jnp.dtype(f2.dtype).itemsize
    TB = _pick_block_batch(N, C * HWp * itemsize)
    Np = _round_up(N, TB)
    if Np != N:                        # zero-pad batch so TB divides it
        f2 = jnp.pad(f2, ((0, Np - N), (0, 0)))
        m = jnp.pad(m, ((0, Np - N), (0, 0)))
    grid = (Np // TB,)
    # TODO(synk): for very large C*H*W (single block exceeds the VMEM budget,
    # esp. v7x's 64 MiB) split into two pallas_calls: masked pool + gate, then
    # a tiled broadcast multiply.

    w1t = jnp.asarray(w1, f2.dtype).T
    w2t = jnp.asarray(w2, f2.dtype).T
    b1r = jnp.asarray(b1, f2.dtype).reshape(1, C)
    b2r = jnp.asarray(b2, f2.dtype).reshape(1, C)

    # Double-buffered feature in/out + mask blocks plus headroom; explicit so
    # v5e's 16 MiB scoped default does not throttle pipelining, capped well
    # under v7x's 64 MiB physical VMEM.
    blk = TB * C * HWp * itemsize
    mblk = TB * HWp * itemsize
    vmem_bytes = int(min(max(2 * (2 * blk + mblk) + (4 << 20), 32 << 20),
                         48 << 20))

    out = pl.pallas_call(
        functools.partial(_spatial_attention_kernel, num_ch=C, hw_pad=HWp,
                          inv_hw=1.0 / HW),
        out_shape=jax.ShapeDtypeStruct((Np, C * HWp), f2.dtype),
        grid_spec=pltpu.PrefetchScalarGridSpec(
            num_scalar_prefetch=0,
            grid=grid,
            in_specs=[
                pl.BlockSpec((TB, C * HWp), lambda i: (i, 0)),   # features
                pl.BlockSpec((TB, HWp), lambda i: (i, 0)),       # mask
                pl.BlockSpec((C, C), lambda i: (0, 0)),          # W1^T
                pl.BlockSpec((1, C), lambda i: (0, 0)),          # b1
                pl.BlockSpec((C, C), lambda i: (0, 0)),          # W2^T
                pl.BlockSpec((1, C), lambda i: (0, 0)),          # b2
            ],
            out_specs=pl.BlockSpec((TB, C * HWp), lambda i: (i, 0)),
        ),
        compiler_params=pltpu.CompilerParams(
            dimension_semantics=("parallel",),
            vmem_limit_bytes=vmem_bytes),
    )(f2, m, w1t, b1r, w2t, b2r)

    out = out[:N].reshape(N, C, HWp)[:, :, :HW]
    return out.reshape(N, C, H, W)


def spatial_attention_ref(Fs, Ys, w1, b1, w2, b2):
    """Pure-JAX reference mirroring the PyTorch forward."""
    N, C, H, W = Fs.shape
    m = _nearest_interp(Ys, H, W)[:, None, :, :]                 # (N,1,H,W)
    masked = m * Fs
    avg = jnp.mean(masked, axis=(2, 3))                          # (N, C)
    h = jnp.maximum(avg @ w1.T + b1, 0.0)
    g = jax.nn.sigmoid(h @ w2.T + b2)                            # (N, C)
    return g[:, :, None, None] * Fs


if __name__ == "__main__":
    N, C, H, W = 2, 4, 16, 16
    h0, w0 = 8, 8   # raw mask resolution (interpolated up to H, W)

    key = jax.random.PRNGKey(0)
    k_fs, k_ys, k_w1, k_b1, k_w2, k_b2 = jax.random.split(key, 6)

    Fs = jax.random.normal(k_fs, (N, C, H, W), dtype=jnp.float32)
    Ys = (jax.random.uniform(k_ys, (N, h0, w0)) > 0.5).astype(jnp.float32)

    # Deterministic synthetic parameters for the two 1x1 convs (C -> C).
    scale = 1.0 / jnp.sqrt(C)
    w1 = jax.random.normal(k_w1, (C, C), dtype=jnp.float32) * scale
    b1 = jax.random.normal(k_b1, (C,), dtype=jnp.float32) * 0.1
    w2 = jax.random.normal(k_w2, (C, C), dtype=jnp.float32) * scale
    b2 = jax.random.normal(k_b2, (C,), dtype=jnp.float32) * 0.1

    out = spatial_attention(Fs, Ys, w1, b1, w2, b2)
    out = jax.block_until_ready(out)

    ref = spatial_attention_ref(Fs, Ys, w1, b1, w2, b2)
    assert out.shape == (N, C, H, W)
    assert jnp.allclose(out, ref, atol=1e-4, rtol=1e-4), "mismatch vs reference"

    print("KERNEL_OK")
</pallas_src>

<mosaic_0001>
module attributes {stable_mosaic.version = 11 : i64} {
  func.func @_spatial_attention_kernel(%arg0: i32, %arg1: memref<2x1024xf32, #tpu.memory_space<vmem>>, %arg2: memref<2x256xf32, #tpu.memory_space<vmem>>, %arg3: memref<4x4xf32, #tpu.memory_space<vmem>>, %arg4: memref<1x4xf32, #tpu.memory_space<vmem>>, %arg5: memref<4x4xf32, #tpu.memory_space<vmem>>, %arg6: memref<1x4xf32, #tpu.memory_space<vmem>>, %arg7: memref<2x1024xf32, #tpu.memory_space<vmem>>) attributes {dimension_semantics = [#tpu.dimension_semantics<parallel>], iteration_bounds = array<i64: 1>, scalar_prefetch = 0 : i64, scratch_operands = 0 : i64, tpu.core_type = #tpu.core_type<tc>, window_params = [{transform_indices = @transform_0, window_bounds = array<i64: 2, 1024>}, {transform_indices = @transform_1, window_bounds = array<i64: 2, 256>}, {pipeline_mode = #tpu.pipeline_mode<synchronous>, transform_indices = @transform_2, window_bounds = array<i64: 4, 4>}, {pipeline_mode = #tpu.pipeline_mode<synchronous>, transform_indices = @transform_3, window_bounds = array<i64: 1, 4>}, {pipeline_mode = #tpu.pipeline_mode<synchronous>, transform_indices = @transform_4, window_bounds = array<i64: 4, 4>}, {pipeline_mode = #tpu.pipeline_mode<synchronous>, transform_indices = @transform_5, window_bounds = array<i64: 1, 4>}, {transform_indices = @transform_6, window_bounds = array<i64: 2, 1024>}]} {
    %c0 = arith.constant 0 : index
    %c0_0 = arith.constant 0 : index
    %0 = vector.load %arg1[%c0, %c0_0] : memref<2x1024xf32, #tpu.memory_space<vmem>>, vector<2x1024xf32>
    %c0_1 = arith.constant 0 : index
    %c0_2 = arith.constant 0 : index
    %1 = vector.load %arg2[%c0_1, %c0_2] : memref<2x256xf32, #tpu.memory_space<vmem>>, vector<2x256xf32>
    %2 = vector.extract_strided_slice %0 {offsets = [0, 0], sizes = [2, 256], strides = [1, 1]} : vector<2x1024xf32> to vector<2x256xf32>
    %3 = arith.mulf %2, %1 : vector<2x256xf32>
    %cst = arith.constant dense<0.000000e+00> : vector<2xf32>
    %4 = vector.multi_reduction <add>, %3, %cst [1] : vector<2x256xf32> to vector<2xf32>
    %5 = vector.shape_cast %4 : vector<2xf32> to vector<2x1xf32>
    %6 = vector.extract_strided_slice %0 {offsets = [0, 256], sizes = [2, 256], strides = [1, 1]} : vector<2x1024xf32> to vector<2x256xf32>
    %7 = arith.mulf %6, %1 : vector<2x256xf32>
    %cst_3 = arith.constant dense<0.000000e+00> : vector<2xf32>
    %8 = vector.multi_reduction <add>, %7, %cst_3 [1] : vector<2x256xf32> to vector<2xf32>
    %9 = vector.shape_cast %8 : vector<2xf32> to vector<2x1xf32>
    %10 = vector.extract_strided_slice %0 {offsets = [0, 512], sizes = [2, 256], strides = [1, 1]} : vector<2x1024xf32> to vector<2x256xf32>
    %11 = arith.mulf %10, %1 : vector<2x256xf32>
    %cst_4 = arith.constant dense<0.000000e+00> : vector<2xf32>
    %12 = vector.multi_reduction <add>, %11, %cst_4 [1] : vector<2x256xf32> to vector<2xf32>
    %13 = vector.shape_cast %12 : vector<2xf32> to vector<2x1xf32>
    %14 = vector.extract_strided_slice %0 {offsets = [0, 768], sizes = [2, 256], strides = [1, 1]} : vector<2x1024xf32> to vector<2x256xf32>
    %15 = arith.mulf %14, %1 : vector<2x256xf32>
    %cst_5 = arith.constant dense<0.000000e+00> : vector<2xf32>
    %16 = vector.multi_reduction <add>, %15, %cst_5 [1] : vector<2x256xf32> to vector<2xf32>
    %17 = vector.shape_cast %16 : vector<2xf32> to vector<2x1xf32>
    %18 = tpu.concatenate %5, %9, %13, %17 in 1 : vector<2x1xf32>, vector<2x1xf32>, vector<2x1xf32>, vector<2x1xf32> -> vector<2x4xf32>
    %cst_6 = arith.constant 3.906250e-03 : f32
    %19 = vector.broadcast %cst_6 : f32 to vector<2x4xf32>
    %20 = arith.mulf %18, %19 : vector<2x4xf32>
    %c0_7 = arith.constant 0 : index
    %c0_8 = arith.constant 0 : index
    %21 = vector.load %arg3[%c0_7, %c0_8] : memref<4x4xf32, #tpu.memory_space<vmem>>, vector<4x4xf32>
    %cst_9 = arith.constant dense<0.000000e+00> : vector<2x4xf32>
    %22 = tpu.matmul %20, %21, %cst_9 {dimension_numbers = #tpu.dot_dimension_numbers<[1], [0], [0], [1], [0, 0, 1, 1], [], []>} : vector<2x4xf32>, vector<4x4xf32>, vector<2x4xf32> -> vector<2x4xf32>
    %c0_10 = arith.constant 0 : index
    %c0_11 = arith.constant 0 : index
    %23 = vector.load %arg4[%c0_10, %c0_11] : memref<1x4xf32, #tpu.memory_space<vmem>>, vector<1x4xf32>
    %24 = vector.broadcast %23 : vector<1x4xf32> to vector<2x4xf32>
    %25 = arith.addf %22, %24 : vector<2x4xf32>
    %cst_12 = arith.constant 0.000000e+00 : f32
    %26 = vector.broadcast %cst_12 : f32 to vector<2x4xf32>
    %27 = arith.maximumf %25, %26 : vector<2x4xf32>
    %c0_13 = arith.constant 0 : index
    %c0_14 = arith.constant 0 : index
    %28 = vector.load %arg5[%c0_13, %c0_14] : memref<4x4xf32, #tpu.memory_space<vmem>>, vector<4x4xf32>
    %cst_15 = arith.constant dense<0.000000e+00> : vector<2x4xf32>
    %29 = tpu.matmul %27, %28, %cst_15 {dimension_numbers = #tpu.dot_dimension_numbers<[1], [0], [0], [1], [0, 0, 1, 1], [], []>} : vector<2x4xf32>, vector<4x4xf32>, vector<2x4xf32> -> vector<2x4xf32>
    %c0_16 = arith.constant 0 : index
    %c0_17 = arith.constant 0 : index
    %30 = vector.load %arg6[%c0_16, %c0_17] : memref<1x4xf32, #tpu.memory_space<vmem>>, vector<1x4xf32>
    %31 = vector.broadcast %30 : vector<1x4xf32> to vector<2x4xf32>
    %32 = arith.addf %29, %31 : vector<2x4xf32>
    %33 = arith.negf %32 : vector<2x4xf32>
    %34 = math.exp %33 : vector<2x4xf32>
    %cst_18 = arith.constant 1.000000e+00 : f32
    %35 = vector.broadcast %cst_18 : f32 to vector<2x4xf32>
    %36 = arith.addf %35, %34 : vector<2x4xf32>
    %37 = arith.divf %35, %36 : vector<2x4xf32>
    %38 = vector.extract_strided_slice %37 {offsets = [0, 0], sizes = [2, 1], strides = [1, 1]} : vector<2x4xf32> to vector<2x1xf32>
    %39 = vector.extract_strided_slice %0 {offsets = [0, 0], sizes = [2, 256], strides = [1, 1]} : vector<2x1024xf32> to vector<2x256xf32>
    %40 = vector.broadcast %38 : vector<2x1xf32> to vector<2x256xf32>
    %41 = arith.mulf %40, %39 : vector<2x256xf32>
    %c0_19 = arith.constant 0 : index
    %c0_20 = arith.constant 0 : index
    %42 = vector.load %arg7[%c0_19, %c0_20] : memref<2x1024xf32, #tpu.memory_space<vmem>>, vector<2x256xf32>
    tpu.vector_store %arg7[%c0_19, %c0_20], %41 {strides = array<i32>} : memref<2x1024xf32, #tpu.memory_space<vmem>>, vector<2x256xf32>,
    %43 = vector.extract_strided_slice %37 {offsets = [0, 1], sizes = [2, 1], strides = [1, 1]} : vector<2x4xf32> to vector<2x1xf32>
    %44 = vector.extract_strided_slice %0 {offsets = [0, 256], sizes = [2, 256], strides = [1, 1]} : vector<2x1024xf32> to vector<2x256xf32>
    %45 = vector.broadcast %43 : vector<2x1xf32> to vector<2x256xf32>
    %46 = arith.mulf %45, %44 : vector<2x256xf32>
    %c0_21 = arith.constant 0 : index
    %c256 = arith.constant 256 : index
    %47 = vector.load %arg7[%c0_21, %c256] : memref<2x1024xf32, #tpu.memory_space<vmem>>, vector<2x256xf32>
    tpu.vector_store %arg7[%c0_21, %c256], %46 {strides = array<i32>} : memref<2x1024xf32, #tpu.memory_space<vmem>>, vector<2x256xf32>,
    %48 = vector.extract_strided_slice %37 {offsets = [0, 2], sizes = [2, 1], strides = [1, 1]} : vector<2x4xf32> to vector<2x1xf32>
    %49 = vector.extract_strided_slice %0 {offsets = [0, 512], sizes = [2, 256], strides = [1, 1]} : vector<2x1024xf32> to vector<2x256xf32>
    %50 = vector.broadcast %48 : vector<2x1xf32> to vector<2x256xf32>
    %51 = arith.mulf %50, %49 : vector<2x256xf32>
    %c0_22 = arith.constant 0 : index
    %c512 = arith.constant 512 : index
    %52 = vector.load %arg7[%c0_22, %c512] : memref<2x1024xf32, #tpu.memory_space<vmem>>, vector<2x256xf32>
    tpu.vector_store %arg7[%c0_22, %c512], %51 {strides = array<i32>} : memref<2x1024xf32, #tpu.memory_space<vmem>>, vector<2x256xf32>,
    %53 = vector.extract_strided_slice %37 {offsets = [0, 3], sizes = [2, 1], strides = [1, 1]} : vector<2x4xf32> to vector<2x1xf32>
    %54 = vector.extract_strided_slice %0 {offsets = [0, 768], sizes = [2, 256], strides = [1, 1]} : vector<2x1024xf32> to vector<2x256xf32>
    %55 = vector.broadcast %53 : vector<2x1xf32> to vector<2x256xf32>
    %56 = arith.mulf %55, %54 : vector<2x256xf32>
    %c0_23 = arith.constant 0 : index
    %c768 = arith.constant 768 : index
    %57 = vector.load %arg7[%c0_23, %c768] : memref<2x1024xf32, #tpu.memory_space<vmem>>, vector<2x256xf32>
    tpu.vector_store %arg7[%c0_23, %c768], %56 {strides = array<i32>} : memref<2x1024xf32, #tpu.memory_space<vmem>>, vector<2x256xf32>,
    return
  }
  func.func @transform_0(%arg0: i32) -> (i32, i32) {
    %c0_i32 = arith.constant 0 : i32
    %c0_i32_0 = arith.constant 0 : i32
    return %arg0, %c0_i32 : i32, i32
  }
  func.func @transform_1(%arg0: i32) -> (i32, i32) {
    %c0_i32 = arith.constant 0 : i32
    %c0_i32_0 = arith.constant 0 : i32
    return %arg0, %c0_i32 : i32, i32
  }
  func.func @transform_2(%arg0: i32) -> (i32, i32) {
    %c0_i32 = arith.constant 0 : i32
    %c0_i32_0 = arith.constant 0 : i32
    %c0_i32_1 = arith.constant 0 : i32
    return %c0_i32, %c0_i32_0 : i32, i32
  }
  func.func @transform_3(%arg0: i32) -> (i32, i32) {
    %c0_i32 = arith.constant 0 : i32
    %c0_i32_0 = arith.constant 0 : i32
    %c0_i32_1 = arith.constant 0 : i32
    return %c0_i32, %c0_i32_0 : i32, i32
  }
  func.func @transform_4(%arg0: i32) -> (i32, i32) {
    %c0_i32 = arith.constant 0 : i32
    %c0_i32_0 = arith.constant 0 : i32
    %c0_i32_1 = arith.constant 0 : i32
    return %c0_i32, %c0_i32_0 : i32, i32
  }
  func.func @transform_5(%arg0: i32) -> (i32, i32) {
    %c0_i32 = arith.constant 0 : i32
    %c0_i32_0 = arith.constant 0 : i32
    %c0_i32_1 = arith.constant 0 : i32
    return %c0_i32, %c0_i32_0 : i32, i32
  }
  func.func @transform_6(%arg0: i32) -> (i32, i32) {
    %c0_i32 = arith.constant 0 : i32
    %c0_i32_0 = arith.constant 0 : i32
    return %arg0, %c0_i32 : i32, i32
  }
}

</mosaic_0001>

<bundles_post_ra>
// kernel: tpu_custom_call.1
= control target key start
LH: loop header
LB: loop body
LE: loop exit
PB: predicated region body
PF: predicated region fallthrough
CT: control target
= control target key end

     0   :  { %11 = vsyncpa [#allocation3], 0  ;;  %s685_s0 = inlined_call_operand.hbm [shape: f32[2,1024], index: 0, kind: input, shape index: {}]   ;;  %s686_s1 = inlined_call_operand.hbm [shape: f32[2,256], index: 1, kind: input, shape index: {}]   ;;  %s687_s2 = inlined_call_operand.hbm [shape: f32[4,4], index: 2, kind: input, shape index: {}]   ;;  %s688_s3 = inlined_call_operand.vmem [shape: f32[1,4], index: 3, kind: input, shape index: {}]   ;;  %s689_s4 = inlined_call_operand.vmem [shape: f32[4,4], index: 4, kind: input, shape index: {}]   ;;  %s690_s5 = inlined_call_operand.vmem [shape: f32[1,4], index: 5, kind: input, shape index: {}]   ;;  %s691_s6 = inlined_call_operand.hbm [shape: f32[2,1024], index: 6, kind: output, shape index: {}]  }
   0x1   :  { %12 = vsyncpa [#allocation6], 0 }
   0x2   :  { %13 = vsyncpa [#allocation4], 0  ;;  %s584_s21 = smov [#allocation5]   ;;  %s585_s23 = smov [#allocation2]  }
   0x3   :  { %s30_s22 = sshll.u32 %s584_s21, 4  ;;  %s20_s24 = sshll.u32 %s585_s23, 4  ;;  %s31_s22 = int_to_ptr.vmem [resolvable:$true] %s30_s22  ;;  %s21_s24 = int_to_ptr.vmem [resolvable:$true] %s20_s24 }
   0x4   :  { %s506_s25 = scalar_lea.vmem %s31_s22, 64  ;;  %p511_p1 = scmp.lt.s32.totalorder %s31_s22, %s31_s22 }
   0x5   :  { %p507_p0 = scmp.ne.s32.totalorder %s31_s22, %s506_s25  ;;  %p512_p2 = scmp.lt.s32.totalorder %s506_s25, %s506_s25 }
   0x7   :  { %p513_p3 = por %p512_p2, %p511_p1 }
   0x9   :  { %p514_p4 = pnand %p513_p3, %p507_p0 }
   0xb   :  { %517 = shalt.err (!%p514_p4)
}
   0xc   :  { %33 = dma.hbm_to_vmem [thread:$0]  %s686_s1, 64, %s31_s22, [#allocation6]  }
   0xd   :  { %s526_s28 = scalar_lea.vmem %s21_s24, 256  ;;  %p531_p6 = scmp.lt.s32.totalorder %s21_s24, %s21_s24 }
   0xe   :  { %p527_p5 = scmp.ne.s32.totalorder %s21_s24, %s526_s28  ;;  %p532_p7 = scmp.lt.s32.totalorder %s526_s28, %s526_s28 }
  0x10   :  { %p533_p8 = por %p532_p7, %p531_p6 }
  0x12   :  { %p534_p9 = pnand %p533_p8, %p527_p5 }
  0x14   :  { %537 = shalt.err (!%p534_p9)
}
  0x15   :  { %23 = dma.hbm_to_vmem [thread:$0]  %s685_s0, 256, %s21_s24, [#allocation3]  }
  0x16   :  { %s586_s7 = smov [#allocation7]  }
  0x17   :  { %s40_s8 = sshll.u32 %s586_s7, 4  ;;  %s41_s8 = int_to_ptr.vmem [resolvable:$true] %s40_s8 }
  0x18   :  { %s546_s9 = scalar_lea.vmem %s41_s8, 64  ;;  %p551_p11 = scmp.lt.s32.totalorder %s41_s8, %s41_s8 }
  0x19   :  { %p547_p10 = scmp.ne.s32.totalorder %s41_s8, %s546_s9  ;;  %p552_p12 = scmp.lt.s32.totalorder %s546_s9, %s546_s9 }
  0x1b   :  { %p553_p13 = por %p552_p12, %p551_p11 }
  0x1d   :  { %p554_p0 = pnand %p553_p13, %p547_p10 }
  0x1f   :  { %557 = shalt.err (!%p554_p0)
}
  0x20   :  { %43 = dma.hbm_to_vmem [thread:$0]  %s687_s2, 64, %s41_s8, [#allocation6]  }
  0x21   :  { %578 = dma.done.wait [#allocation3], 256  }
  0x22   :  { %579 = vsyncadd [#allocation3], 4294967040 }
  0x23   :  { %580 = dma.done.wait [#allocation6], 128  }
  0x24   :  { %581 = vsyncadd [#allocation6], 4294967168  ;;  %v67_v0 = vlaneseq  ;;  %v587_v1 = vmov 1983009808   ;;  %v641_v6 = vld [vmem:[#allocation2] sm:$0xff]  ;;  %v643_v8 = vld [vmem:[#allocation2 + $0x8] sm:$0xff] }
  0x25   :  { %v65_v2 = vunpack.c.l.s4 %v587_v1  ;;  %v61_v7 = vld [vmem:[#allocation5] sm:$0xf]  ;;  %v81_v11 = vrot.slane %v641_v6, 4  ;;  %v118_v12 = vrot.slane %v643_v8, 4  ;;  %vm74_vm0 = vcmask 1041408  }
  0x26   :  { %v68_v3 = vshrl.u32 %v67_v0, 7  ;;  %v62_v9 = vmul.f32 %v61_v7, %v641_v6  ;;  %v100_v10 = vmul.f32 %v61_v7, %v643_v8  ;;  %v588_v35 = vmov 0.0   ;;  %v144_v36 = vld [vmem:[#allocation7] sm:$0xf]  ;;  %v231_v45 = vld [vmem:[%s689_s4] sm:$0xf] }
  0x27   :  { %v66_v4 = vunpack.c.0.s8 %v65_v2  ;;  %v83_v15 = vmul.f32 %v81_v11, %v61_v7  ;;  %v120_v16 = vmul.f32 %v118_v12, %v61_v7  ;;  %467 = vmatprep.subr.mxu0 %v588_v35  ;;  %vm156_vm1 = vcmask 1043456   ;;  %472 = vmatprep.subr.mxu1 %v588_v35  ;;  %v452_v46 = vld [vmem:[%s688_s3] ss:$0 sm:$0xff]  ;;  %s594_s3 = smov [#allocation8]  }
  0x28   :  { %468 = vmatpush3.msk.msra.mxu0 %vm156_vm1, %v144_v36  ;;  %vm589_vm2 = vmmov 0   ;;  %vm137_vm3 = vcmask 7168   ;;  %vm139_vm4 = vcmask 15360   ;;  %vm141_vm5 = vcmask 23552   ;;  %473 = vmatpush3.msk.msra.mxu1 %vm156_vm1, %v231_v45  ;;  %v455_v53 = vld [vmem:[%s690_s5] ss:$0 sm:$0xff] }
  0x29   :  { %v639_v5 = vsub.s32 %v66_v4, %v68_v3  ;;  %469 = vmatprep.mubr.msk.f32.mxu0 %vm589_vm2, %v588_v35  ;;  %474 = vmatprep.mubr.msk.f32.mxu1 %vm589_vm2, %v588_v35  ;;  %vm152_vm6 = vcmask 31744   ;;  %v590_v51 = vmov 1   ;;  %v591_v52 = vmov 0   ;;  %s442_s4 = sshll.u32 %s594_s3, 4  ;;  %s443_s4 = int_to_ptr.vmem [resolvable:$true] %s442_s4 }
  0x2a   :  { %489 = vset.pattern.permute.xlu1 %v590_v51  ;;  %488 = vset.pattern.permute.xlu0 %v591_v52  ;;  %v592_v61 = vmov 2   ;;  %v593_v62 = vmov 3   ;;  %v354_v63 = vcombine.high %v641_v6, %v641_v6  ;;  %v411_v7 = vcombine.high %v643_v8, %v643_v8  ;;  %s558_s5 = scalar_lea.vmem %s443_s4, 256  ;;  %p563_p2 = scmp.lt.s32.totalorder %s443_s4, %s443_s4 }
  0x2b   :  { %v70_v13 = vrot.slane %v62_v9, %v639_v5  ;;  %v108_v14 = vrot.slane %v100_v10, %v639_v5  ;;  %v91_v21 = vrot.slane %v83_v15, %v639_v5  ;;  %v128_v22 = vrot.slane %v120_v16, %v639_v5  ;;  %p559_p1 = scmp.ne.s32.totalorder %s443_s4, %s558_s5  ;;  %p564_p3 = scmp.lt.s32.totalorder %s558_s5, %s558_s5 }
  0x2c   :  { %v361_v0 = vrot.slane %v354_v63, %v639_v5  ;;  %v332_v1 = vrot.slane %v641_v6, %v639_v5  ;;  %v389_v4 = vrot.slane %v643_v8, %v639_v5 }
  0x2d   :  { %v71_v17 = vcombine.high %v70_v13, %v70_v13  ;;  %v75_v18 = vsel %vm74_vm0, %v70_v13, 0.0  ;;  %v109_v19 = vcombine.high %v108_v14, %v108_v14  ;;  %v112_v20 = vsel %vm74_vm0, %v108_v14, 0.0  ;;  %p565_p4 = por %p564_p3, %p563_p2 }
  0x2e   :  { %v92_v27 = vcombine.high %v91_v21, %v91_v21  ;;  %v95_v28 = vsel %vm74_vm0, %v91_v21, 0.0  ;;  %v129_v29 = vcombine.high %v128_v22, %v128_v22  ;;  %v132_v30 = vsel %vm74_vm0, %v128_v22, 0.0 }
  0x2f   :  { %v76_v23 = vsel %vm74_vm0, %v71_v17, 0.0  ;;  %v113_v24 = vsel %vm74_vm0, %v109_v19, 0.0  ;;  %v362_v2 = vcombine.high %v361_v0, %v361_v0  ;;  %v333_v3 = vcombine.high %v332_v1, %v332_v1  ;;  %p566_p5 = pnand %p565_p4, %p559_p1 }
  0x30   :  { %v77_v25 = vadd.f32 %v76_v23, %v75_v18  ;;  %v114_v26 = vadd.f32 %v113_v24, %v112_v20  ;;  %v96_v31 = vsel %vm74_vm0, %v92_v27, 0.0  ;;  %v133_v33 = vsel %vm74_vm0, %v129_v29, 0.0 }
  0x31   :  { %v97_v32 = vadd.f32 %v96_v31, %v95_v28  ;;  %v134_v34 = vadd.f32 %v133_v33, %v132_v30  ;;  %v390_v15 = vcombine.high %v389_v4, %v389_v4  ;;  %v418_v18 = vrot.slane %v411_v7, %v639_v5 }
  0x32   :  { %78 = vadd.xlane.f32.xlu0 %v77_v25  ;;  %115 = vadd.xlane.f32.xlu1 %v114_v26 }
  0x33   :  { %v419_v21 = vcombine.high %v418_v18, %v418_v18 }
  0x36   :  { %98 = vadd.xlane.f32.xlu0 %v97_v32  ;;  %135 = vadd.xlane.f32.xlu1 %v134_v34 }
  0xbb   :  { %v79_v37 = vpop.xlane.xlu0 %78  ;;  %v116_v38 = vpop.xlane.xlu1 %115 }
  0xbf   :  { %v99_v39 = vpop.xlane.xlu0 %98  ;;  %v136_v40 = vpop.xlane.xlu1 %135 }
  0xc0   :  { %v138_v41 = vsel %vm137_vm3, %v79_v37, %v99_v39 }
  0xc1   :  { %v140_v42 = vsel %vm139_vm4, %v138_v41, %v116_v38 }
  0xc2   :  { %v142_v43 = vsel %vm141_vm5, %v140_v42, %v136_v40 }
  0xc3   :  { %v143_v44 = vmul.f32 0.00390625, %v142_v43 }
  0xc5   :  { %470 = vmatmul.mubr.msk.f32.vlgmr.msra.gmra.mxu0 %vm152_vm6, %v143_v44 }
 0x185   :  { %v226_v47 = vpop.f32.mrf.mxu0 }
 0x186   :  { %v227_v48 = vadd.f32 %v452_v46, %v226_v47 }
 0x187   :  { %v471_v49 = vpop.f32.mrf.mxu0 }
 0x188   :  { %v230_v50 = vmax.f32 %v227_v48, 0.0 }
 0x18a   :  { %475 = vmatmul.mubr.msk.f32.vlgmr.msra.gmra.mxu1 %vm152_vm6, %v230_v50 }
 0x24a   :  { %v311_v54 = vpop.f32.mrf.mxu1 }
 0x24b   :  { %v312_v55 = vadd.f32 %v455_v53, %v311_v54 }
 0x24c   :  { %v476_v56 = vpop.f32.mrf.mxu1 }
 0x24d   :  { %v458_v57 = vmul.f32 -1.442695, %v312_v55 }
 0x24f   :  { %494 = vpow2.f32 %v458_v57 }
 0x25c   :  { %v495_v58 = vpop.eup %494 }
 0x25d   :  { %v318_v59 = vadd.f32 1.0, %v495_v58 }
 0x25f   :  { %496 = vrcp.f32 %v318_v59 }
 0x26c   :  { %v497_v60 = vpop.eup %496 }
 0x26d   :  { %351 = vperm.xlu1 %489, %v497_v60   ;;  %323 = vperm.xlu0 %488, %v497_v60  }
 0x271   :  { %490 = vset.pattern.permute.xlu1 %v592_v61  ;;  %492 = vset.pattern.permute.xlu0 %v593_v62 }
 0x272   :  { %380 = vperm.xlu1 %490, %v497_v60  }
 0x276   :  { %491 = vset.pattern.permute.xlu1 %v593_v62 }
 0x277   :  { %408 = vperm.xlu1 %491, %v497_v60  }
 0x2e8   :  { %v352_v9 = vpop.permute.xlu1 %351  ;;  %v324_v10 = vpop.permute.xlu0 %323 }
 0x2e9   :  { %v365_v11 = vmul.f32 %v361_v0, %v352_v9  ;;  %v366_v12 = vmul.f32 %v362_v2, %v352_v9  ;;  %v336_v13 = vmul.f32 %v332_v1, %v324_v10  ;;  %v337_v14 = vmul.f32 %v333_v3, %v324_v10 }
 0x2eb   :  { %v369_v16 = vcombine.low %v365_v11, %v366_v12  ;;  %v340_v17 = vcombine.low %v336_v13, %v337_v14 }
 0x2ed   :  { %460 = vst.sshfl [vmem:[#allocation8 + $0x4] sm:$0x33 pattern:$0x76325410] %v369_v16  ;;  %v381_v6 = vpop.permute.xlu1 %380 }
 0x2ee   :  { %459 = vst.sshfl [vmem:[#allocation8] sm:$0x33 pattern:$0x76325410] %v340_v17  ;;  %v393_v19 = vmul.f32 %v389_v4, %v381_v6  ;;  %v394_v20 = vmul.f32 %v390_v15, %v381_v6 }
 0x2f0   :  { %v397_v22 = vcombine.low %v393_v19, %v394_v20 }
 0x2f2   :  { %461 = vst.sshfl [vmem:[#allocation8 + $0x8] sm:$0x33 pattern:$0x76325410] %v397_v22  ;;  %v409_v8 = vpop.permute.xlu1 %408 }
 0x2f3   :  { %v422_v23 = vmul.f32 %v418_v18, %v409_v8  ;;  %v423_v24 = vmul.f32 %v419_v21, %v409_v8 }
 0x2f5   :  { %v426_v25 = vcombine.low %v422_v23, %v423_v24 }
 0x2f7   :  { %462 = vst.sshfl [vmem:[#allocation8 + $0xc] sm:$0x33 pattern:$0x76325410] %v426_v25 }
 0x2f8   :  { %569 = shalt.err (!%p566_p5)
}
 0x2f9   :  { %445 = dma.vmem_to_hbm [thread:$0]  %s443_s4, 256, %s691_s6, [#allocation4]  }
 0x2fa   :  { %582 = dma.done.wait [#allocation4], 256  }
 0x2fb   :  { %583 = vsyncadd [#allocation4], 4294967040 }
 0x2fc   :  { %449 = vsyncpa [#allocation3], 1 }
 0x2fd   :  { %450 = vsyncpa [#allocation6], 1 }
 0x2fe   :  { %451 = vsyncpa [#allocation4], 1 }

</bundles_post_ra>
